<compile_context>
chip_gen: v5e
topology: v5e:2x2
jax: 0.10.0
libtpu: 0.0.40
codegen_flags: <defaults>
</compile_context>

<pallas_src>
import functools

import jax
import jax.numpy as jnp
from jax.experimental import pallas as pl
from jax.experimental.pallas import tpu as pltpu

_LANE = 128
_TILE_BYTES = 4 * 1024 * 1024       # per-input HBM-stream tile budget
_VMEM_LIMIT = 48 * 1024 * 1024      # scoped VMEM limit (safe on v5e/v6e/v7x)


def _l1_partial_kernel(pred_ref, tgt_ref, acc_ref, *, rows, block_rows,
                       tiles_per_chunk, n_tiles, mask_rows):
    """Accumulates |pred - tgt| per-lane/per-sublane partial sums into acc_ref (1,8,L)."""
    c = pl.program_id(0)   # chunk axis ("parallel"; split across TCs on v7x)
    j = pl.program_id(1)   # row-tile axis ("arbitrary"; reduction)

    @pl.when(j == 0)
    def _init():
        acc_ref[...] = jnp.zeros_like(acc_ref)

    diff = jnp.abs(pred_ref[...].astype(jnp.float32)
                   - tgt_ref[...].astype(jnp.float32))

    groups = block_rows // 8   # block_rows is always a positive multiple of 8

    def _fold(d):
        # Pairwise tree of (8, L) sublane-group slabs: pure vreg adds (VPU only),
        # no reshape, no cross-sublane XLU reduce; also gives pairwise-summation
        # numerics for large tiles.
        parts = [d[g * 8:(g + 1) * 8] for g in range(groups)]
        while len(parts) > 1:
            nxt = [a + b for a, b in zip(parts[::2], parts[1::2])]
            if len(parts) % 2:
                nxt.append(parts[-1])
            parts = nxt
        return parts[0][None]   # (1, 8, L)

    if mask_rows:
        # Only the single global boundary tile pays for the row mask.
        is_boundary = (c * tiles_per_chunk + j) == (n_tiles - 1)

        @pl.when(is_boundary)
        def _masked():
            row_base = (c * tiles_per_chunk + j) * block_rows
            local = jax.lax.broadcasted_iota(jnp.int32, (block_rows, 1), 0)
            masked = jnp.where(row_base + local < rows, diff, 0.0)
            acc_ref[...] += _fold(masked)

        @pl.when(jnp.logical_not(is_boundary))
        def _plain():
            acc_ref[...] += _fold(diff)
    else:
        acc_ref[...] += _fold(diff)


def _as_2d_view(x):
    """Zero-copy lane-dense 2D view of x (no jnp.pad, no HBM copy)."""
    total = int(x.size)
    for lane in (512, 256, 128):
        if total % lane == 0:
            return x.reshape(total // lane, lane)
    # Fallback for non-128-aligned element counts: keep the original minor dim
    # as the lane axis (still zero-copy; ragged rows are masked in-kernel).
    if x.ndim >= 2:
        return x.reshape(-1, x.shape[-1])
    return x.reshape(total, 1)


def l1_loss_pallas(pred, target, *, tile_bytes=_TILE_BYTES):
    """Mean absolute error (equivalent to torch.nn.L1Loss()(pred, target))."""
    assert pred.shape == target.shape, (pred.shape, target.shape)
    assert pred.dtype == target.dtype, (pred.dtype, target.dtype)
    total = int(pred.size)

    p2 = _as_2d_view(pred)
    t2 = _as_2d_view(target)
    rows, lane_width = (int(p2.shape[0]), int(p2.shape[1]))

    itemsize = int(pred.dtype.itemsize)
    # VMEM rows are padded to 128 lanes; size tiles by their VMEM/HBM footprint.
    padded_lanes = ((lane_width + _LANE - 1) // _LANE) * _LANE
    row_bytes = padded_lanes * itemsize
    cap_rows = max(8, (tile_bytes // row_bytes) // 8 * 8)
    block_rows = min(cap_rows, ((rows + 7) // 8) * 8)   # multiple of 8, >= 8

    n_tiles = -(-rows // block_rows)
    # Two perfectly balanced chunks (v7x: one per TensorCore). On single-TC
    # chips the second chunk is just a serial continuation with its own tiny
    # output block -- no phantom/duplicated tiles.
    num_chunks = 2 if (n_tiles >= 2 and n_tiles % 2 == 0) else 1
    tiles_per_chunk = n_tiles // num_chunks
    mask_rows = (rows % block_rows) != 0

    kernel = functools.partial(
        _l1_partial_kernel,
        rows=rows, block_rows=block_rows,
        tiles_per_chunk=tiles_per_chunk, n_tiles=n_tiles,
        mask_rows=mask_rows,
    )

    def in_index(c, j):
        return (c * tiles_per_chunk + j, 0)

    partials = pl.pallas_call(
        kernel,
        out_shape=jax.ShapeDtypeStruct((num_chunks, 8, lane_width), jnp.float32),
        grid_spec=pltpu.PrefetchScalarGridSpec(
            num_scalar_prefetch=0,
            grid=(num_chunks, tiles_per_chunk),
            in_specs=[
                pl.BlockSpec((block_rows, lane_width), in_index),
                pl.BlockSpec((block_rows, lane_width), in_index),
            ],
            out_specs=pl.BlockSpec((1, 8, lane_width), lambda c, j: (c, 0, 0)),
        ),
        compiler_params=pltpu.CompilerParams(
            dimension_semantics=("parallel", "arbitrary"),
            vmem_limit_bytes=_VMEM_LIMIT,
        ),
        cost_estimate=pl.CostEstimate(
            flops=2 * total,
            transcendentals=0,
            bytes_accessed=2 * total * itemsize + num_chunks * 8 * lane_width * 4,
        ),
    )(p2, t2)

    # Final tiny cross-lane / cross-sublane / cross-chunk reduction + mean scaling.
    return jnp.sum(partials) * (1.0 / float(total))


class SetCriterion:
    """JAX/Pallas re-implementation of the PyTorch SetCriterion forward pass."""

    def __init__(self, losses, weight_dict):
        self.weight_dict = weight_dict
        self.losses = losses
        self.loss_dicts = {}

    def __call__(self, outputs, targets, *args, **kwargs):
        for k in self.losses.keys():
            loss = self.losses[k]
            if k == "Loss":
                loss_dicts = loss(outputs, targets)
            else:
                loss_dicts = loss(outputs, targets, *args)
            if isinstance(loss_dicts, dict):
                self.loss_dicts.update(loss_dicts)
            else:
                self.loss_dicts.update({k: loss_dicts})
        return self.loss_dicts


if __name__ == "__main__":
    key = jax.random.PRNGKey(0)
    k1, k2, k3, k4, k5, k6 = jax.random.split(key, 6)

    # --- Small NCHW example consistent with the IPT restoration output. ---
    B, C, H, W = 2, 4, 16, 16
    outputs = jax.random.normal(k1, (B, C, H, W), dtype=jnp.float32)
    targets = jax.random.normal(k2, (B, C, H, W), dtype=jnp.float32)

    criterion = SetCriterion(losses={"Loss": l1_loss_pallas},
                             weight_dict={"Loss": 1.0})
    loss_dicts = criterion(outputs, targets)
    loss_val = jax.block_until_ready(loss_dicts["Loss"])
    ref = jnp.mean(jnp.abs(outputs - targets))
    assert jnp.allclose(loss_val, ref, rtol=1e-5, atol=1e-6), (loss_val, ref)

    # --- Multi-tile + balanced 2-chunk path (small tile budget to exercise grid). ---
    o2 = jax.random.normal(k3, (2, 3, 256, 384), dtype=jnp.float32)
    t2 = jax.random.normal(k4, (2, 3, 256, 384), dtype=jnp.float32)
    loss2 = jax.block_until_ready(l1_loss_pallas(o2, t2, tile_bytes=64 * 1024))
    ref2 = jnp.mean(jnp.abs(o2 - t2))
    assert jnp.allclose(loss2, ref2, rtol=1e-4, atol=1e-5), (loss2, ref2)

    # --- bf16 inputs: dtype-aware tiling, f32 accumulation inside the kernel. ---
    o3 = jax.random.normal(k5, (2, 4, 16, 16), dtype=jnp.bfloat16)
    t3 = jax.random.normal(k6, (2, 4, 16, 16), dtype=jnp.bfloat16)
    loss3 = jax.block_until_ready(l1_loss_pallas(o3, t3))
    ref3 = jnp.mean(jnp.abs(o3.astype(jnp.float32) - t3.astype(jnp.float32)))
    assert jnp.allclose(loss3, ref3, rtol=1e-3, atol=1e-3), (loss3, ref3)

    # --- Non-128-aligned element count: zero-copy fallback view (no jnp.pad). ---
    o4 = jax.random.normal(k1, (3, 5, 7, 9), dtype=jnp.float32)
    t4 = jax.random.normal(k2, (3, 5, 7, 9), dtype=jnp.float32)
    loss4 = jax.block_until_ready(l1_loss_pallas(o4, t4))
    ref4 = jnp.mean(jnp.abs(o4 - t4))
    assert jnp.allclose(loss4, ref4, rtol=1e-5, atol=1e-6), (loss4, ref4)

    print("KERNEL_OK")
</pallas_src>

<mosaic_0001>
module attributes {stable_mosaic.version = 11 : i64} {
  func.func @_l1_partial_kernel(%arg0: i32, %arg1: i32, %arg2: memref<8x512xf32, #tpu.memory_space<vmem>>, %arg3: memref<8x512xf32, #tpu.memory_space<vmem>>, %arg4: memref<1x8x512xf32, #tpu.memory_space<vmem>>) attributes {dimension_semantics = [#tpu.dimension_semantics<parallel>, #tpu.dimension_semantics<arbitrary>], iteration_bounds = array<i64: 1, 1>, scalar_prefetch = 0 : i64, scratch_operands = 0 : i64, tpu.core_type = #tpu.core_type<tc>, window_params = [{transform_indices = @transform_0, window_bounds = array<i64: 8, 512>}, {transform_indices = @transform_1, window_bounds = array<i64: 8, 512>}, {transform_indices = @transform_2, window_bounds = array<i64: 1, 8, 512>}]} {
    %c0_i32 = arith.constant 0 : i32
    %0 = arith.cmpi eq, %arg1, %c0_i32 : i32
    %1 = arith.extui %0 : i1 to i32
    %c0_i32_0 = arith.constant 0 : i32
    %2 = arith.cmpi ne, %1, %c0_i32_0 : i32
    scf.if %2 {
      %cst = arith.constant 0.000000e+00 : f32
      %15 = vector.broadcast %cst : f32 to vector<1x8x512xf32>
      %c0_7 = arith.constant 0 : index
      %c0_8 = arith.constant 0 : index
      %c0_9 = arith.constant 0 : index
      %16 = vector.load %arg4[%c0_7, %c0_8, %c0_9] : memref<1x8x512xf32, #tpu.memory_space<vmem>>, vector<1x8x512xf32>
      tpu.vector_store %arg4[%c0_7, %c0_8, %c0_9], %15 {strides = array<i32>} : memref<1x8x512xf32, #tpu.memory_space<vmem>>, vector<1x8x512xf32>,
    } else {
    }
    %c0 = arith.constant 0 : index
    %c0_1 = arith.constant 0 : index
    %3 = vector.load %arg2[%c0, %c0_1] : memref<8x512xf32, #tpu.memory_space<vmem>>, vector<8x512xf32>
    %c0_2 = arith.constant 0 : index
    %c0_3 = arith.constant 0 : index
    %4 = vector.load %arg3[%c0_2, %c0_3] : memref<8x512xf32, #tpu.memory_space<vmem>>, vector<8x512xf32>
    %5 = arith.subf %3, %4 : vector<8x512xf32>
    %6 = math.absf %5 : vector<8x512xf32>
    %c1_i32 = arith.constant 1 : i32
    %7 = arith.muli %arg0, %c1_i32 : i32
    %8 = arith.addi %7, %arg1 : i32
    %c0_i32_4 = arith.constant 0 : i32
    %9 = arith.cmpi eq, %8, %c0_i32_4 : i32
    %10 = arith.extui %9 : i1 to i32
    %c0_i32_5 = arith.constant 0 : i32
    %11 = arith.cmpi ne, %10, %c0_i32_5 : i32
    scf.if %11 {
      %c1_i32_7 = arith.constant 1 : i32
      %15 = arith.muli %arg0, %c1_i32_7 : i32
      %16 = arith.addi %15, %arg1 : i32
      %c8_i32 = arith.constant 8 : i32
      %17 = arith.muli %16, %c8_i32 : i32
      %18 = tpu.iota {dimensions = array<i32: 0>} : vector<8x1xi32>
      %19 = vector.broadcast %17 : i32 to vector<8x1xi32>
      %20 = arith.addi %19, %18 : vector<8x1xi32>
      %c4_i32 = arith.constant 4 : i32
      %21 = vector.broadcast %c4_i32 : i32 to vector<8x1xi32>
      %22 = arith.cmpi slt, %20, %21 : vector<8x1xi32>
      %cst = arith.constant 0.000000e+00 : f32
      %23 = vector.shape_cast %22 : vector<8x1xi1> to vector<8x1xi1>
      %24 = vector.broadcast %23 : vector<8x1xi1> to vector<8x512xi1>
      %25 = vector.broadcast %cst : f32 to vector<8x512xf32>
      %26 = arith.select %24, %6, %25 : vector<8x512xi1>, vector<8x512xf32>
      %c0_8 = arith.constant 0 : index
      %c0_9 = arith.constant 0 : index
      %c0_10 = arith.constant 0 : index
      %27 = vector.load %arg4[%c0_8, %c0_9, %c0_10] : memref<1x8x512xf32, #tpu.memory_space<vmem>>, vector<1x8x512xf32>
      %28 = vector.shape_cast %26 : vector<8x512xf32> to vector<1x8x512xf32>
      %29 = arith.addf %27, %28 : vector<1x8x512xf32>
      %c0_11 = arith.constant 0 : index
      %c0_12 = arith.constant 0 : index
      %c0_13 = arith.constant 0 : index
      %30 = vector.load %arg4[%c0_11, %c0_12, %c0_13] : memref<1x8x512xf32, #tpu.memory_space<vmem>>, vector<1x8x512xf32>
      tpu.vector_store %arg4[%c0_11, %c0_12, %c0_13], %29 {strides = array<i32>} : memref<1x8x512xf32, #tpu.memory_space<vmem>>, vector<1x8x512xf32>,
    } else {
    }
    %true = arith.constant true
    %12 = arith.xori %9, %true : i1
    %13 = arith.extui %12 : i1 to i32
    %c0_i32_6 = arith.constant 0 : i32
    %14 = arith.cmpi ne, %13, %c0_i32_6 : i32
    scf.if %14 {
      %c0_7 = arith.constant 0 : index
      %c0_8 = arith.constant 0 : index
      %c0_9 = arith.constant 0 : index
      %15 = vector.load %arg4[%c0_7, %c0_8, %c0_9] : memref<1x8x512xf32, #tpu.memory_space<vmem>>, vector<1x8x512xf32>
      %16 = vector.shape_cast %6 : vector<8x512xf32> to vector<1x8x512xf32>
      %17 = arith.addf %15, %16 : vector<1x8x512xf32>
      %c0_10 = arith.constant 0 : index
      %c0_11 = arith.constant 0 : index
      %c0_12 = arith.constant 0 : index
      %18 = vector.load %arg4[%c0_10, %c0_11, %c0_12] : memref<1x8x512xf32, #tpu.memory_space<vmem>>, vector<1x8x512xf32>
      tpu.vector_store %arg4[%c0_10, %c0_11, %c0_12], %17 {strides = array<i32>} : memref<1x8x512xf32, #tpu.memory_space<vmem>>, vector<1x8x512xf32>,
    } else {
    }
    return
  }
  func.func @transform_0(%arg0: i32, %arg1: i32) -> (i32, i32) {
    %c1_i32 = arith.constant 1 : i32
    %0 = arith.muli %arg0, %c1_i32 : i32
    %1 = arith.addi %0, %arg1 : i32
    %c0_i32 = arith.constant 0 : i32
    %c0_i32_0 = arith.constant 0 : i32
    return %1, %c0_i32 : i32, i32
  }
  func.func @transform_1(%arg0: i32, %arg1: i32) -> (i32, i32) {
    %c1_i32 = arith.constant 1 : i32
    %0 = arith.muli %arg0, %c1_i32 : i32
    %1 = arith.addi %0, %arg1 : i32
    %c0_i32 = arith.constant 0 : i32
    %c0_i32_0 = arith.constant 0 : i32
    return %1, %c0_i32 : i32, i32
  }
  func.func @transform_2(%arg0: i32, %arg1: i32) -> (i32, i32, i32) {
    %c0_i32 = arith.constant 0 : i32
    %c0_i32_0 = arith.constant 0 : i32
    %c0_i32_1 = arith.constant 0 : i32
    return %arg0, %c0_i32, %c0_i32_0 : i32, i32, i32
  }
}

</mosaic_0001>

<bundles_post_ra>
// kernel: tpu_custom_call.1
= control target key start
LH: loop header
LB: loop body
LE: loop exit
PB: predicated region body
PF: predicated region fallthrough
CT: control target
= control target key end

     0   :  { %7 = vsyncpa [#allocation3], 0  ;;  %s314_s0 = inlined_call_operand.hbm [shape: f32[4,512], index: 0, kind: input, shape index: {}]   ;;  %s315_s1 = inlined_call_operand.hbm [shape: f32[4,512], index: 1, kind: input, shape index: {}]   ;;  %s316_s2 = inlined_call_operand.hbm [shape: f32[1,8,512], index: 2, kind: output, shape index: {}]  }
   0x1   :  { %8 = vsyncpa [#allocation6], 0 }
   0x2   :  { %9 = vsyncpa [#allocation4], 0 }
   0x3   :  { %19 = vsyncadd [#allocation3], 256  ;;  %s25_s11 = sshll.u32 %s314_s0, 4  ;;  %s285_s12 = smov [#allocation2]   ;;  %s26_s11 = int_to_ptr.hbm [resolvable:$true] %s25_s11 }
   0x4   :  { %s27_s13 = sshll.u32 %s285_s12, 4  ;;  %s286_s14 = smov 256   ;;  %s28_s13 = int_to_ptr.vmem [resolvable:$true] %s27_s13 }
   0x5   :  { %s287_s15 = smov 16  }
   0x6   :  { %33 = dma.hbm_to_vmem [thread:$0]  %s26_s11, 256, %s28_s13, [#allocation3], %s286_s14, %s286_s14, %s287_s15  }
   0x7   :  { %43 = vsyncadd [#allocation6], 256  ;;  %s49_s18 = sshll.u32 %s315_s1, 4  ;;  %s288_s19 = smov [#allocation5]   ;;  %s50_s18 = int_to_ptr.hbm [resolvable:$true] %s49_s18 }
   0x8   :  { %s51_s20 = sshll.u32 %s288_s19, 4  ;;  %s52_s20 = int_to_ptr.vmem [resolvable:$true] %s51_s20 }
   0x9   :  { %57 = dma.hbm_to_vmem [thread:$0]  %s50_s18, 256, %s52_s20, [#allocation6], %s286_s14, %s286_s14, %s287_s15  }
   0xa   :  { %279 = dma.done.wait [#allocation3], 512  }
   0xb   :  { %280 = vsyncadd [#allocation3], 4294966784 }
   0xc   :  { %281 = dma.done.wait [#allocation6], 512  }
   0xd   :  { %282 = vsyncadd [#allocation6], 4294966784  ;;  %v84_v0 = vld [vmem:[#allocation2] sm:$0xff]  ;;  %v86_v2 = vld [vmem:[#allocation2 + $0x10] sm:$0xff]  ;;  %v106_v13 = vlaneseq  ;;  %s289_s0 = smov [#allocation7]   ;;  %s190_s23 = sshll.u32 %s316_s2, 4  ;;  %s191_s23 = int_to_ptr.hbm [resolvable:$true] %s190_s23 }
   0xe   :  { %v88_v1 = vld [vmem:[#allocation5] sm:$0xff]  ;;  %v90_v4 = vld [vmem:[#allocation5 + $0x10] sm:$0xff]  ;;  %v85_v5 = vld [vmem:[#allocation2 + $0x8] sm:$0xff]  ;;  %s188_s1 = sshll.u32 %s289_s0, 4  ;;  %s189_s1 = int_to_ptr.vmem [resolvable:$true] %s188_s1 }
   0xf   :  { %v92_v3 = vsub.f32 %v84_v0, %v88_v1  ;;  %v89_v6 = vld [vmem:[#allocation5 + $0x8] sm:$0xff]  ;;  %v94_v7 = vsub.f32 %v86_v2, %v90_v4  ;;  %v87_v9 = vld [vmem:[#allocation2 + $0x18] sm:$0xff]  ;;  %v107_v17 = vshrl.u32 %v106_v13, 7 }
  0x10   :  { %v93_v8 = vsub.f32 %v85_v5, %v89_v6  ;;  %v91_v10 = vld [vmem:[#allocation5 + $0x18] sm:$0xff] }
  0x11   :  { %v96_v11 = vand.u32 2147483647, %v92_v3  ;;  %v95_v12 = vsub.f32 %v87_v9, %v91_v10  ;;  %v98_v14 = vand.u32 2147483647, %v94_v7  ;;  %vm110_vm0 = vcmp.lt.s32.totalorder %v107_v17, 4 }
  0x12   :  { %v97_v15 = vand.u32 2147483647, %v93_v8 }
  0x13   :  { %117 = vst [vmem:[#allocation1] ss:$2 sm:$0xff] %v96_v11  ;;  %v99_v16 = vand.u32 2147483647, %v95_v12 }
  0x14   :  { %119 = vst [vmem:[#allocation1 + $0x1] ss:$2 sm:$0xff] %v98_v14 }
  0x15   :  { %121 = vst [vmem:[#allocation1 + $0x10] ss:$2 sm:$0xff] %v97_v15 }
  0x16   :  { %123 = vst [vmem:[#allocation1 + $0x11] ss:$2 sm:$0xff] %v99_v16 }
  0x1b   :  { %v124_v18 = vld.sshfl [vmem:[#allocation1] sm:$0xff pattern:$0x75316420]  ;;  %v125_v19 = vld.sshfl [vmem:[#allocation1 + $0x8] sm:$0xff pattern:$0x75316420] }
  0x1c   :  { %v132_v20 = vsel %vm110_vm0, %v124_v18, 0.0  ;;  %v133_v21 = vsel %vm110_vm0, %v125_v19, 0.0 }
  0x1d   :  { %v126_v22 = vld.sshfl [vmem:[#allocation1 + $0x10] sm:$0xff pattern:$0x75316420]  ;;  %v127_v23 = vld.sshfl [vmem:[#allocation1 + $0x18] sm:$0xff pattern:$0x75316420] }
  0x1e   :  { %v134_v24 = vsel %vm110_vm0, %v126_v22, 0.0  ;;  %v135_v25 = vsel %vm110_vm0, %v127_v23, 0.0  ;;  %144 = vst [vmem:[#allocation7] sm:$0xff] %v132_v20 }
  0x1f   :  { %145 = vst [vmem:[#allocation7 + $0x8] sm:$0xff] %v133_v21 }
  0x20   :  { %146 = vst [vmem:[#allocation7 + $0x10] sm:$0xff] %v134_v24 }
  0x21   :  { %147 = vst [vmem:[#allocation7 + $0x18] sm:$0xff] %v135_v25 }
  0x22   :  { %193 = dma.vmem_to_hbm [thread:$0]  %s189_s1, 512, %s191_s23, [#allocation4]  }
  0x23   :  { %283 = dma.done.wait [#allocation4], 512  }
  0x24   :  { %284 = vsyncadd [#allocation4], 4294966784 }
  0x25   :  { %198 = vsyncpa [#allocation3], 1 }
  0x26   :  { %199 = vsyncpa [#allocation6], 1 }
  0x27   :  { %200 = vsyncpa [#allocation4], 1 }

</bundles_post_ra>
